<compile_context>
chip_gen: v7x
topology: tpu7x:2x2x1
jax: 0.10.0
libtpu: 0.0.40
codegen_flags: <defaults>
</compile_context>

<pallas_src>
import jax
import jax.numpy as jnp
import numpy as np
from jax.experimental import pallas as pl
from jax.experimental.pallas import tpu as pltpu


def _round_up(x, m):
    return (x + m - 1) // m * m


def _conv1x1_kernel(x_ref, w_ref, b_ref, o_ref):
    # x_ref: (1, Cin, thw)   pixels of one batch element, channels on sublanes
    # w_ref: (Cin, Cout)     1x1 conv weights (pre-transposed in the wrapper)
    # b_ref: (1, Cout)       bias, broadcast along the pixel axis
    # o_ref: (1, thw, Cout)  output tile already in NHWC-flattened order
    acc = jax.lax.dot_general(
        x_ref[0], w_ref[...],
        dimension_numbers=(((0,), (0,)), ((), ())),   # x^T @ W -> (thw, Cout)
        preferred_element_type=jnp.float32,
        precision=jax.lax.Precision.HIGHEST,
    )
    o_ref[0] = (acc + b_ref[...]).astype(o_ref.dtype)


def landmark_head_forward(x_nchw, weight, bias, num_anchors=3, tile_hw=4096):
    """x_nchw: (N, Cin, H, W); weight: (Cout, Cin, 1, 1); bias: (Cout,)."""
    N, Cin, H, W = x_nchw.shape
    Cout = weight.shape[0]
    assert Cout == num_anchors * 10
    HW = H * W

    # Lane-dense pixel tiling: multiples of 128 lanes, capped at the feature
    # map size.  Ragged tails are handled by Pallas edge-block masking (no pad).
    thw = max(128, (tile_hw // 128) * 128)
    thw = min(thw, _round_up(HW, 128))
    if N == 1 and HW > 128:
        # v7x has 2 TensorCores: make sure the parallel grid has >= 2 steps.
        thw = min(thw, _round_up(pl.cdiv(HW, 2), 128))
    num_hw_tiles = pl.cdiv(HW, thw)

    x_mat = x_nchw.reshape(N, Cin, HW)                       # view, no copy/pad
    w_mat = weight.reshape(Cout, Cin).T.astype(x_nchw.dtype)  # (Cin, Cout), tiny
    b_mat = bias.reshape(1, Cout).astype(jnp.float32)         # accumulate in f32

    out = pl.pallas_call(
        _conv1x1_kernel,
        out_shape=jax.ShapeDtypeStruct((N, HW, Cout), x_nchw.dtype),
        grid_spec=pltpu.PrefetchScalarGridSpec(
            num_scalar_prefetch=0,
            grid=(N, num_hw_tiles),
            in_specs=[
                pl.BlockSpec((1, Cin, thw), lambda n, j: (n, 0, j)),
                pl.BlockSpec((Cin, Cout), lambda n, j: (0, 0)),
                pl.BlockSpec((1, Cout), lambda n, j: (0, 0)),
            ],
            out_specs=pl.BlockSpec((1, thw, Cout), lambda n, j: (n, j, 0)),
        ),
        compiler_params=pltpu.CompilerParams(
            dimension_semantics=("parallel", "parallel"),
        ),
    )(x_mat, w_mat, b_mat)

    # (N, HW, Cout) -> (N, HW*A, 10): pure row-major reshape, no data movement.
    return out.reshape(N, HW * num_anchors, 10)


def _reference(x, weight, bias, num_anchors):
    N, Cin, H, W = x.shape
    Cout = weight.shape[0]
    ref = (jnp.einsum("nchw,oc->nhwo", x, weight.reshape(Cout, Cin),
                      precision=jax.lax.Precision.HIGHEST)
           + bias)
    return ref.reshape(N, H * W * num_anchors, 10)


if __name__ == "__main__":
    num_anchors = 3
    Cout = num_anchors * 10
    key = jax.random.PRNGKey(0)

    # Case 1: small, aligned feature map (batch=2, inchannels=32, 16x16).
    # Case 2: N=1 with a non-128-divisible HW (20x20=400) to exercise the
    #         no-pad ragged final block and the v7x two-tile split.
    cases = [(2, 32, 16, 16), (1, 32, 20, 20)]

    for (N, Cin, H, W) in cases:
        key, kx, kw, kb = jax.random.split(key, 4)
        x = jax.random.normal(kx, (N, Cin, H, W), dtype=jnp.float32)
        weight = jax.random.normal(kw, (Cout, Cin, 1, 1), dtype=jnp.float32) * 0.05
        bias = jax.random.normal(kb, (Cout,), dtype=jnp.float32) * 0.05

        out = landmark_head_forward(x, weight, bias, num_anchors=num_anchors)
        out = jax.block_until_ready(out)

        ref = _reference(x, weight, bias, num_anchors)
        np.testing.assert_allclose(np.asarray(out), np.asarray(ref),
                                   rtol=1e-5, atol=1e-5)
        assert out.shape == (N, H * W * num_anchors, 10)

    print("KERNEL_OK")
</pallas_src>

<mosaic_0001>
module attributes {stable_mosaic.version = 11 : i64} {
  func.func @_conv1x1_kernel(%arg0: i32, %arg1: i32, %arg2: memref<1x32x256xf32, #tpu.memory_space<vmem>>, %arg3: memref<32x30xf32, #tpu.memory_space<vmem>>, %arg4: memref<1x30xf32, #tpu.memory_space<vmem>>, %arg5: memref<1x256x30xf32, #tpu.memory_space<vmem>>) attributes {dimension_semantics = [#tpu.dimension_semantics<parallel>, #tpu.dimension_semantics<parallel>], iteration_bounds = array<i64: 2, 1>, scalar_prefetch = 0 : i64, scratch_operands = 0 : i64, tpu.core_type = #tpu.core_type<tc>, window_params = [{transform_indices = @transform_0, window_bounds = array<i64: 1, 32, 256>}, {pipeline_mode = #tpu.pipeline_mode<synchronous>, transform_indices = @transform_1, window_bounds = array<i64: 32, 30>}, {pipeline_mode = #tpu.pipeline_mode<synchronous>, transform_indices = @transform_2, window_bounds = array<i64: 1, 30>}, {transform_indices = @transform_3, window_bounds = array<i64: 1, 256, 30>}]} {
    %c0 = arith.constant 0 : index
    %c0_0 = arith.constant 0 : index
    %c0_1 = arith.constant 0 : index
    %0 = vector.load %arg2[%c0, %c0_0, %c0_1] : memref<1x32x256xf32, #tpu.memory_space<vmem>>, vector<1x32x256xf32>
    %1 = vector.shape_cast %0 : vector<1x32x256xf32> to vector<32x256xf32>
    %c0_2 = arith.constant 0 : index
    %c0_3 = arith.constant 0 : index
    %2 = vector.load %arg3[%c0_2, %c0_3] : memref<32x30xf32, #tpu.memory_space<vmem>>, vector<32x30xf32>
    %cst = arith.constant dense<0.000000e+00> : vector<256x30xf32>
    %3 = tpu.matmul %1, %2, %cst {dimension_numbers = #tpu.dot_dimension_numbers<[0], [0], [1], [1], [0, 1, 1, 1], [], []>, precision = #tpu.contract_precision<fp32>} : vector<32x256xf32>, vector<32x30xf32>, vector<256x30xf32> -> vector<256x30xf32>
    %c0_4 = arith.constant 0 : index
    %c0_5 = arith.constant 0 : index
    %4 = vector.load %arg4[%c0_4, %c0_5] : memref<1x30xf32, #tpu.memory_space<vmem>>, vector<1x30xf32>
    %5 = vector.broadcast %4 : vector<1x30xf32> to vector<256x30xf32>
    %6 = arith.addf %3, %5 : vector<256x30xf32>
    %c0_6 = arith.constant 0 : index
    %c0_7 = arith.constant 0 : index
    %c0_8 = arith.constant 0 : index
    %7 = vector.load %arg5[%c0_6, %c0_7, %c0_8] : memref<1x256x30xf32, #tpu.memory_space<vmem>>, vector<1x256x30xf32>
    %8 = vector.shape_cast %7 : vector<1x256x30xf32> to vector<256x30xf32>
    %9 = vector.shape_cast %6 : vector<256x30xf32> to vector<1x256x30xf32>
    tpu.vector_store %arg5[%c0_6, %c0_7, %c0_8], %9 {strides = array<i32>} : memref<1x256x30xf32, #tpu.memory_space<vmem>>, vector<1x256x30xf32>,
    return
  }
  func.func @transform_0(%arg0: i32, %arg1: i32) -> (i32, i32, i32) {
    %c0_i32 = arith.constant 0 : i32
    %c0_i32_0 = arith.constant 0 : i32
    return %arg0, %c0_i32, %arg1 : i32, i32, i32
  }
  func.func @transform_1(%arg0: i32, %arg1: i32) -> (i32, i32) {
    %c0_i32 = arith.constant 0 : i32
    %c0_i32_0 = arith.constant 0 : i32
    %c0_i32_1 = arith.constant 0 : i32
    return %c0_i32, %c0_i32_0 : i32, i32
  }
  func.func @transform_2(%arg0: i32, %arg1: i32) -> (i32, i32) {
    %c0_i32 = arith.constant 0 : i32
    %c0_i32_0 = arith.constant 0 : i32
    %c0_i32_1 = arith.constant 0 : i32
    return %c0_i32, %c0_i32_0 : i32, i32
  }
  func.func @transform_3(%arg0: i32, %arg1: i32) -> (i32, i32, i32) {
    %c0_i32 = arith.constant 0 : i32
    %c0_i32_0 = arith.constant 0 : i32
    return %arg0, %arg1, %c0_i32 : i32, i32, i32
  }
}

</mosaic_0001>

<bundles_post_ra>
// kernel: tpu_custom_call.1
= control target key start
LH: loop header
LB: loop body
LE: loop exit
PB: predicated region body
PF: predicated region fallthrough
CT: control target
= control target key end

     0   :  { %8 = vsyncpa [#allocation3], 0  ;;  %s4106_s0 = inlined_call_operand.hbm [shape: f32[2,32,256], index: 0, kind: input, shape index: {}]   ;;  %s4107_s1 = inlined_call_operand.hbm [shape: f32[32,30], index: 1, kind: input, shape index: {}]   ;;  %s4108_s2 = inlined_call_operand.vmem [shape: f32[1,30], index: 2, kind: input, shape index: {}]   ;;  %s4109_s3 = inlined_call_operand.vmem [shape: f32[2,256,30], index: 3, kind: output, shape index: {}]  }
   0x1   :  { %10 = vsyncpa [#allocation3 + $0x1], 0 }
   0x2   :  { %11 = vsyncpa [#allocation5], 0  ;;  %s3391_s12 = smov 0   ;;  %s3393_s13 = smov 0  }
   0x3   :  { %s3395_s14 = smov 0   ;;  %s3397_s15 = smov 0  }
   0x4   :  { %s3399_s16 = smov 0   ;;  %s3401_s17 = smov 0  }
   0x5 LB: > { %s2370_s18 = sadd.s32 4294967295, %s3363_s17   ;;  %p51_p0 = scmp.ne.s32.totalorder %s3347_s13, %s3343_s12  ;;  %s3363_s17 = sphi %s3401_s17, %s17_s17   ;;  %s3359_s16 = sphi %s3399_s16, %s4186_s16   ;;  %s3355_s15 = sphi %s3397_s15, %s4185_s15   ;;  %s3351_s14 = sphi %s3395_s14, %s4184_s14   ;;  %s3347_s13 = sphi %s3393_s13, %s4183_s13   ;;  %s3343_s12 = sphi %s3391_s12, %s4182_s12  }
   0x6   : > { %p3421_p1 = scmp.eq.s32.totalorder %s2370_s18, 0  ;;  %p2372_p2 = scmp.ge.s32.totalorder %s3363_s17, 1 }
   0x7   : > { %p132_p3 = scmp.lt.s32.totalorder %s3363_s17, 3  ;;  %s3365_s22 = smov [#allocation4]  }
   0x8   : > { %s4134_s19 = scalar_select %p3421_p1, 1, 0 }
   0x9   : > { %p3429_p4 = por %p3421_p1, %p51_p0  ;;  %p3433_p5 = pnand %p2372_p2, %p132_p3 }
   0xa   : > { %s144_s23 = sshll.u32 %s3365_s22, 4  ;;  %s29_s25 = sadd.s32 1, %s3359_s16  ;;  %s145_s23 = int_to_ptr.vmem [resolvable:$true] %s144_s23 }
   0xb   : > { %s4135_s20 = scalar_select %p3429_p4, 1, 0 }
   0xc   : > { %s4136_s21 = scalar_select %p3433_p5, 1, 0 }
   0xd   : > { %p3186_p6 = pneg %p3433_p5  ;;  %s3251_s28 = scalar_lea.hbm %s4107_s1, 512 }
   0xe   : > { %p3252_p8 = scmp.ne.s32.totalorder %s4107_s1, %s3251_s28  ;;  %p3258_p12 = scmp.lt.u32.totalorder %s3251_s28, %s4107_s1 }
   0xf   : > { %p3441_p7 = pnand %p3186_p6, %p3421_p1 }
  0x11   : > { %p3253_p9 = pneg %p3441_p7 }
  0x13   : > { %p3254_p10 = pnand %p3253_p9, %p3252_p8 }
  0x15   : > { %p3255_p11 = pneg %p3254_p10 }
  0x17   : > { %p3260_p13 = pnand %p3258_p12, %p3255_p11 }
  0x19   : > { %3263 = shalt.err (!%p3260_p13)
}
  0x1a   : > { %s3264_s6 = scalar_lea.vmem %s145_s23, 512  ;;  %p3272_p6 = scmp.lt.s32.totalorder %s145_s23, %s145_s23 }
  0x1b   : > { %p3265_p0 = scmp.ne.s32.totalorder %s145_s23, %s3264_s6  ;;  %p3273_p1 = scmp.lt.s32.totalorder %s3264_s6, %s3264_s6 }
  0x1d   : > { %p3267_p2 = pnand %p3265_p0, %p3253_p9  ;;  %p3274_p4 = por %p3273_p1, %p3272_p6 }
  0x1f   : > { %p3268_p3 = pneg %p3267_p2 }
  0x21   : > { %p3275_p5 = pnand %p3274_p4, %p3268_p3 }
  0x23   : > { %3278 = shalt.err (!%p3275_p5)
}
  0x24   : > { %s3366_s7 = smov 128   ;;  %s3367_s8 = smov 8  }
  0x25   : > { %3189 = dma.hbm_to_vmem [thread:$0]  (!%p3441_p7), %s4107_s1, 512, %s145_s23, [#allocation5], %s3366_s7, %s3366_s7, %s3367_s8  }
  0x26   : > { %p31_p1 = scmp.ge.s32.totalorder %s29_s25, 2  ;;  %s38_s11 = sadd.s32 1, %s3351_s14 }
  0x27   : > { %p45_p4 = scmp.ne.s32.totalorder %s3351_s14, %s3347_s13  ;;  %p46_p5 = scmp.eq.s32.totalorder %s3363_s17, 0 }
  0x28   : > { %s4188_s25 = smov (%p31_p1, %s29_s25), 0  ;;  %p3195_p9 = scmp.lt.s32.totalorder %s3363_s17, 2 }
  0x29   : > { %p47_p8 = por %p46_p5, %p45_p4  ;;  %s33_s12 = ssub.s32 %s3359_s16, %s4188_s25 }
  0x2a   : > { %s161_s18 = sand.u32 1, %s3351_s14   ;;  %p36_p10 = scmp.eq.s32.totalorder %s33_s12, 0 }
  0x2b   : > { %s2375_s22 = sshll.u32 %s161_s18, 6  ;;  %s2386_s26 = sshll.u32 %s3359_s16, 10 }
  0x2c   : > { %s3474_s27 = scalar_select %p36_p10, %s3351_s14, %s38_s11  }
  0x2d   : > { %s3479_s23 = scalar_lea.hbm %s4106_s0, %s2386_s26  ;;  %s165_s29 = scalar_lea.vmem [#allocation2], %s2375_s22 }
  0x2e   : > { %s174_s30 = sshll.u32 %s165_s29, 4  ;;  %p3481_p7 = pnand %p3195_p9, %p47_p8  ;;  %s3485_s30 = int_to_ptr.vmem [resolvable:$true] %s174_s30 }
  0x2f   : > { %s3487_s5 = scalar_lea.sflag [#allocation3], %s161_s18  ;;  %s3279_s6 = scalar_lea.hbm %s3479_s23, 1024 }
  0x30   : > { %p3280_p11 = scmp.ne.s32.totalorder %s3479_s23, %s3279_s6  ;;  %p3281_p12 = pneg %p3481_p7 }
  0x31   : > { %s3284_s9 = scalar_lea.hbm %s4106_s0, 2048  ;;  %p3285_p2 = scmp.lt.u32.totalorder %s3479_s23, %s4106_s0 }
  0x32   : > { %p3282_p13 = pnand %p3281_p12, %p3280_p11  ;;  %p3286_p3 = scmp.lt.u32.totalorder %s3284_s9, %s3279_s6 }
  0x33   : > { %p3288_p1 = scmp.lt.u32.totalorder %s3279_s6, %s3479_s23 }
  0x34   : > { %p3283_p0 = pneg %p3282_p13  ;;  %p3287_p6 = por %p3286_p3, %p3285_p2 }
  0x36   : > { %p3289_p4 = por %p3288_p1, %p3287_p6 }
  0x38   : > { %p3290_p5 = pnand %p3289_p4, %p3283_p0 }
  0x3a   : > { %3293 = shalt.err (!%p3290_p5)
}
  0x3b   : > { %s3294_s12 = scalar_lea.vmem %s3485_s30, 1024  ;;  %s3368_s18 = smov [#allocation2]  }
  0x3c   : > { %p3295_p8 = scmp.ne.s32.totalorder %s3485_s30, %s3294_s12  ;;  %s3299_s22 = sshll.u32 %s3368_s18, 4  ;;  %s3300_s22 = int_to_ptr.vmem [resolvable:$false] %s3299_s22 }
  0x3d   : > { %s3301_s26 = scalar_lea.vmem %s3300_s22, 2048  ;;  %p3302_p11 = scmp.lt.s32.totalorder %s3485_s30, %s3300_s22 }
  0x3e   : > { %p3297_p9 = pnand %p3295_p8, %p3281_p12  ;;  %p3303_p13 = scmp.lt.s32.totalorder %s3301_s26, %s3294_s12 }
  0x40   : > { %p3298_p10 = pneg %p3297_p9  ;;  %p3304_p2 = por %p3303_p13, %p3302_p11 }
  0x42   : > { %p3305_p3 = pnand %p3304_p2, %p3298_p10 }
  0x44   : > { %3308 = shalt.err (!%p3305_p3)
}
  0x45   : > { %s3369_s24 = smov 256   ;;  %s3370_s28 = smov 16  }
  0x46   : > { %3193 = dma.hbm_to_vmem [thread:$0]  (!%p3481_p7), %s3479_s23, 1024, %s3485_s30, %s3487_s5, %s3369_s24, %s3369_s24, %s3370_s28  }
  0x47   : > { %p4139_p12 = scmp.ne.s32.totalorder %s4136_s21, 0 }
  0x49   : > { %186 = sbr.rel (%p4139_p12) target bundleno = 666 (0x29a), region = 32 }
  0x50   : > { %s188_s29 = sand.u32 1, %s3347_s13   ;;  %p4140_p0 = scmp.ne.s32.totalorder %s4135_s20, 0 }
  0x51   : > { %s2379_s6 = sshll.u32 %s188_s29, 6  ;;  %s189_s7 = scalar_lea.sflag [#allocation3], %s188_s29 }
  0x52   : > { %s3518_s8 = scalar_lea.vmem [#allocation2], %s2379_s6 }
  0x53   : > { %3334 = dma.done.wait (%p4140_p0), %s189_s7, 1024  }
  0x54   : > { %3336 = vsyncadd (%p4140_p0), %s189_s7, 4294966272  ;;  %p4141_p6 = scmp.ne.s32.totalorder %s4134_s19, 0 }
  0x56   : > { %3338 = dma.done.wait (%p4141_p6), [#allocation5], 512  }
  0x57   : > { %3340 = vsyncadd (%p4141_p6), [#allocation5], 4294966784  ;;  %v234_v0 = vld [vmem:[%s3518_s8] sm:$0xff]  ;;  %v235_v1 = vld [vmem:[%s3518_s8 + $0x8] sm:$0xff]  ;;  %vm317_vm0 = vcmask 261120   ;;  %p225_p7 = scmp.lt.s32.totalorder %s3355_s15, 1 }
  0x58   : > { %253 = vxpose.xlu0.b32.start [1/4] (short) %v234_v0, 128  ;;  %v236_v2 = vld [vmem:[%s3518_s8 + $0x10] sm:$0xff]  ;;  %285 = vxpose.xlu1.b32.start [1/4] (short) %v235_v1, 128  ;;  %v242_v3 = vld [vmem:[#allocation4] sm:$0xff]  ;;  %v237_v4 = vld [vmem:[%s3518_s8 + $0x18] sm:$0xff]  ;;  %vm2232_vm1 = vcmask 244736  }
  0x59   : > { %v243_v5 = vld [vmem:[#allocation4 + $0x8] sm:$0xff]  ;;  %v415_v6 = vand.u32 4294901760, %v242_v3  ;;  %v244_v8 = vld [vmem:[#allocation4 + $0x10] sm:$0xff]  ;;  %v245_v9 = vld [vmem:[#allocation4 + $0x18] sm:$0xff]  ;;  %s4190_s15 = smov (!%p225_p7, %s3355_s15), 1 }
  0x5a   : > { %v418_v7 = vand.u32 4294901760, %v243_v5  ;;  %v421_v10 = vand.u32 4294901760, %v244_v8  ;;  %v424_v11 = vand.u32 4294901760, %v245_v9  ;;  %v238_v12 = vld [vmem:[%s3518_s8 + $0x20] sm:$0xff]  ;;  %v239_v14 = vld [vmem:[%s3518_s8 + $0x28] sm:$0xff]  ;;  %v240_v16 = vld [vmem:[%s3518_s8 + $0x30] sm:$0xff] }
  0x5b   : > { %v241_v17 = vld [vmem:[%s3518_s8 + $0x38] sm:$0xff]  ;;  %v805_v18 = vsub.f32 %v242_v3, %v415_v6  ;;  %s2387_s21 = sshll.u32 %s4190_s15, 8 }
  0x5c   : > { %254 = vxpose.xlu0.b32.cont [2/4] (short) %v236_v2, 128  ;;  %286 = vxpose.xlu1.b32.cont [2/4] (short) %v237_v4, 128  ;;  %v3533_v13 = vpack.c.bf16 %v418_v7, %v415_v6  ;;  %v3536_v15 = vpack.c.bf16 %v424_v11, %v421_v10  ;;  %v812_v19 = vsub.f32 %v243_v5, %v418_v7  ;;  %s3991_s4 = scalar_lea.vmem %s4109_s3, %s2387_s21 }
  0x5d   : > { %v806_v20 = vand.u32 4294901760, %v805_v18  ;;  %v819_v29 = vsub.f32 %v244_v8, %v421_v10  ;;  %v826_v30 = vsub.f32 %v245_v9, %v424_v11 }
  0x5e   : > { %2965 = vmatprep.subr.bf16.mxu0 %v3533_v13  ;;  %2941 = vmatprep.subr.bf16.mxu1 %v3533_v13  ;;  %v813_v21 = vand.u32 4294901760, %v812_v19  ;;  %v3548_v28 = vpack.c.bf16 %v812_v19, %v805_v18 }
  0x5f   : > { %2967 = vmatpush3.bf16.msra.mxu0 %v3533_v13  ;;  %2943 = vmatpush3.bf16.msra.mxu1 %v3533_v13  ;;  %v807_v22 = vsub.f32 %v805_v18, %v806_v20  ;;  %v820_v34 = vand.u32 4294901760, %v819_v29  ;;  %v827_v36 = vand.u32 4294901760, %v826_v30  ;;  %v3571_v52 = vpack.c.bf16 %v826_v30, %v819_v29 }
  0x60   : > { %255 = vxpose.xlu0.b32.cont [3/4] (short) %v238_v12, 128  ;;  %287 = vxpose.xlu1.b32.cont [3/4] (short) %v239_v14, 128  ;;  %v814_v23 = vsub.f32 %v812_v19, %v813_v21  ;;  %v2972_v24 = vpack.c.bf16 %v813_v21, %v806_v20 }
  0x61   : > { %2969 = vmatprep.subr.bf16.mxu0 %v3536_v15  ;;  %2945 = vmatprep.subr.bf16.mxu1 %v3536_v15  ;;  %v808_v25 = vand.u32 4294901760, %v807_v22  ;;  %v821_v41 = vsub.f32 %v819_v29, %v820_v34  ;;  %v828_v44 = vsub.f32 %v826_v30, %v827_v36  ;;  %v2976_v51 = vpack.c.bf16 %v827_v36, %v820_v34 }
  0x62   : > { %v815_v26 = vand.u32 4294901760, %v814_v23 }
  0x63   : > { %2971 = vmatpush3.bf16.msra.mxu0 %v3536_v15  ;;  %2947 = vmatpush3.bf16.msra.mxu1 %v3536_v15  ;;  %v822_v50 = vand.u32 4294901760, %v821_v41  ;;  %v829_v56 = vand.u32 4294901760, %v828_v44 }
  0x64   : > { %256 = vxpose.xlu0.b32.end [4/4] (short) %v240_v16, 128  ;;  %288 = vxpose.xlu1.b32.end [4/4] (short) %v241_v17, 128  ;;  %v2948_v27 = vpack.c.bf16 %v815_v26, %v808_v25 }
  0x65   : > { %2973 = vmatprep.subr.bf16.mxu0 %v2972_v24  ;;  %v2952_v1 = vpack.c.bf16 %v829_v56, %v822_v50 }
  0x66   : > { %2949 = vmatprep.subr.bf16.mxu1 %v2948_v27 }
  0xd8   : > { %v269_v31 = vpop.trf.xlu0  ;;  %v3551_v33 = vpop.trf.xlu1 }
  0xd9   : > { %v319_v32 = vsel %vm317_vm0, %v269_v31, 0 }
  0xda   : > { %v3553_v35 = vand.u32 4294901760, %v319_v32 }
  0xdc   : > { %v3556_v37 = vsub.f32 %v319_v32, %v3553_v35  ;;  %v270_v38 = vpop.trf.xlu0  ;;  %v3559_v40 = vpop.trf.xlu1 }
  0xdd   : > { %v322_v39 = vsel %vm317_vm0, %v270_v38, 0 }
  0xde   : > { %v3561_v42 = vand.u32 4294901760, %v322_v39  ;;  %v485_v43 = vand.u32 4294901760, %v3556_v37 }
  0xe0   : > { %v3565_v45 = vsub.f32 %v322_v39, %v3561_v42  ;;  %2780 = vmatprep.mubr.f32.mxu0 %v485_v43  ;;  %v271_v46 = vpop.trf.xlu0  ;;  %v486_v47 = vsub.f32 %v3556_v37, %v485_v43  ;;  %v3569_v49 = vpop.trf.xlu1 }
  0xe1   : > { %v325_v48 = vsel %vm317_vm0, %v271_v46, 0 }
  0xe2   : > { %v3573_v53 = vand.u32 4294901760, %v325_v48  ;;  %v487_v54 = vand.u32 4294901760, %v486_v47  ;;  %v495_v55 = vand.u32 4294901760, %v3565_v45 }
  0xe4   : > { %v3577_v57 = vsub.f32 %v325_v48, %v3573_v53  ;;  %2612 = vmatprep.mubr.f32.mxu1 %v487_v54  ;;  %2781 = vmatmul.mubr.f32.vlgmr.msra.gmra.mrb[0].mxu0 %v495_v55  ;;  %v272_v58 = vpop.trf.xlu0  ;;  %v496_v59 = vsub.f32 %v3565_v45, %v495_v55  ;;  %v3581_v61 = vpop.trf.xlu1 }
  0xe5   : > { %v328_v60 = vsel %vm317_vm0, %v272_v58, 0  ;;  %2975 = vmatpush3.bf16.msra.mxu0 %v2972_v24 }
  0xe6   : > { %v3583_v62 = vand.u32 4294901760, %v328_v60  ;;  %v497_v63 = vand.u32 4294901760, %v496_v59  ;;  %v505_v0 = vand.u32 4294901760, %v3577_v57  ;;  %2977 = vmatprep.subr.bf16.mxu0 %v2976_v51 }
  0xe8   : > { %v3587_v2 = vsub.f32 %v328_v60, %v3583_v62  ;;  %2613 = vmatmul.mubr.f32.vlgmr.msra.gmra.mrb[0].mxu1 %v497_v63  ;;  %2783 = vmatprep.mubr.f32.mxu0 %v505_v0  ;;  %v273_v3 = vpop.trf.xlu0  ;;  %v506_v4 = vsub.f32 %v3577_v57, %v505_v0  ;;  %v3591_v6 = vpop.trf.xlu1 }
  0xe9   : > { %v331_v5 = vsel %vm317_vm0, %v273_v3, 0  ;;  %2951 = vmatpush3.bf16.msra.mxu1 %v2948_v27  ;;  %2979 = vmatpush3.bf16.msra.mxu0 %v2976_v51 }
  0xea   : > { %v3593_v7 = vand.u32 4294901760, %v331_v5  ;;  %v507_v8 = vand.u32 4294901760, %v506_v4  ;;  %v515_v9 = vand.u32 4294901760, %v3587_v2  ;;  %2953 = vmatprep.subr.bf16.mxu1 %v2952_v1  ;;  %2981 = vmatprep.subr.bf16.mxu0 %v3533_v13 }
  0xec   : > { %v3598_v10 = vsub.f32 %v331_v5, %v3593_v7  ;;  %2615 = vmatprep.mubr.f32.mxu1 %v507_v8  ;;  %2784 = vmatmul.mubr.f32.gmra.mrb[2].mxu0 %v515_v9  ;;  %v274_v11 = vpop.trf.xlu0  ;;  %v516_v12 = vsub.f32 %v3587_v2, %v515_v9  ;;  %v3602_v16 = vpop.trf.xlu1 }
  0xed   : > { %v334_v14 = vsel %vm317_vm0, %v274_v11, 0  ;;  %2955 = vmatpush3.bf16.msra.mxu1 %v2952_v1 }
  0xee   : > { %v3604_v17 = vand.u32 4294901760, %v334_v14  ;;  %v517_v18 = vand.u32 4294901760, %v516_v12  ;;  %v525_v19 = vand.u32 4294901760, %v3598_v10  ;;  %2957 = vmatprep.subr.bf16.mxu1 %v3548_v28 }
  0xf0   : > { %v3609_v20 = vsub.f32 %v334_v14, %v3604_v17  ;;  %2616 = vmatmul.mubr.f32.gmra.mrb[2].mxu1 %v517_v18  ;;  %2786 = vmatprep.mubr.f32.mxu0 %v525_v19  ;;  %v275_v21 = vpop.trf.xlu0  ;;  %v526_v22 = vsub.f32 %v3598_v10, %v525_v19  ;;  %v3616_v27 = vpop.trf.xlu1 }
  0xf1   : > { %v337_v23 = vsel %vm317_vm0, %v275_v21, 0 }
  0xf2   : > { %4142 = vst [vmem:[#allocation8_spill] sm:$0xff] %v3609_v20  ;;  %v3613_v24 = vand.u32 4294901760, %v337_v23  ;;  %v527_v25 = vand.u32 4294901760, %v526_v22  ;;  %v535_v26 = vand.u32 4294901760, %v3609_v20 }
  0xf4   : > { %v3619_v29 = vsub.f32 %v337_v23, %v3613_v24  ;;  %2618 = vmatprep.mubr.f32.mxu1 %v527_v25  ;;  %2787 = vmatmul.mubr.f32.gmra.mrb[4].mxu0 %v535_v26  ;;  %v276_v30 = vpop.trf.xlu0  ;;  %v536_v31 = vsub.f32 %v3609_v20, %v535_v26  ;;  %v3630_v44 = vpop.trf.xlu1 }
  0xf5   : > { %v340_v32 = vsel %vm317_vm0, %v276_v30, 0 }
  0xf6   : > { %4143 = vst [vmem:[#allocation9_spill] sm:$0xff] %v3619_v29  ;;  %v3623_v34 = vand.u32 4294901760, %v340_v32  ;;  %v537_v36 = vand.u32 4294901760, %v536_v31  ;;  %v545_v38 = vand.u32 4294901760, %v3619_v29 }
  0xf8   : > { %v3627_v39 = vsub.f32 %v340_v32, %v3623_v34  ;;  %2619 = vmatmul.mubr.f32.gmra.mrb[4].mxu1 %v537_v36  ;;  %2789 = vmatprep.mubr.f32.mxu0 %v545_v38  ;;  %v277_v41 = vpop.trf.xlu0  ;;  %v546_v43 = vsub.f32 %v3619_v29, %v545_v38  ;;  %v3644_v63 = vpop.trf.xlu1 }
  0xf9   : > { %v343_v46 = vsel %vm317_vm0, %v277_v41, 0 }
  0xfa   : > { %4144 = vst [vmem:[#allocation10_spill] sm:$0xff] %v3627_v39  ;;  %v3633_v47 = vand.u32 4294901760, %v343_v46  ;;  %v547_v48 = vand.u32 4294901760, %v546_v43  ;;  %v555_v50 = vand.u32 4294901760, %v3627_v39  ;;  %v367_v43 = vsel %vm317_vm0, %v3551_v33, 0 }
  0xfb   : > { %v373_v33 = vsel %vm317_vm0, %v3569_v49, 0 }
  0xfc   : > { %v3637_v51 = vsub.f32 %v343_v46, %v3633_v47  ;;  %2621 = vmatprep.mubr.f32.mxu1 %v547_v48  ;;  %2790 = vmatmul.mubr.f32.gmra.mrb[6].mxu0 %v555_v50  ;;  %v278_v54 = vpop.trf.xlu0  ;;  %v556_v55 = vsub.f32 %v3627_v39, %v555_v50  ;;  %v3658_v18 = vpop.trf.xlu1 }
  0xfd   : > { %v346_v56 = vsel %vm317_vm0, %v278_v54, 0 }
  0xfe   : > { %4145 = vst [vmem:[#allocation11_spill] sm:$0xff] %v3637_v51  ;;  %v3641_v58 = vand.u32 4294901760, %v346_v56  ;;  %v557_v59 = vand.u32 4294901760, %v556_v55  ;;  %v565_v60 = vand.u32 4294901760, %v3637_v51  ;;  %v370_v55 = vsel %vm317_vm0, %v3559_v40, 0 }
  0xff   : > { %v3696_v40 = vand.u32 4294901760, %v370_v55 }
 0x100   : > { %v3647_v0 = vsub.f32 %v346_v56, %v3641_v58  ;;  %2622 = vmatmul.mubr.f32.gmra.mrb[6].mxu1 %v557_v59  ;;  %2792 = vmatprep.mubr.f32.mxu0 %v565_v60  ;;  %v279_v1 = vpop.trf.xlu0  ;;  %v566_v3 = vsub.f32 %v3637_v51, %v565_v60  ;;  %v3672_v41 = vpop.trf.xlu1 }
 0x101   : > { %v349_v4 = vsel %vm317_vm0, %v279_v1, 0  ;;  %v3686_v1 = vand.u32 4294901760, %v367_v43 }
 0x102   : > { %4146 = vst [vmem:[#allocation12_spill] sm:$0xff] %v3647_v0  ;;  %v3651_v5 = vand.u32 4294901760, %v349_v4  ;;  %v567_v8 = vand.u32 4294901760, %v566_v3  ;;  %v575_v9 = vand.u32 4294901760, %v3647_v0 }
 0x104   : > { %v3655_v11 = vsub.f32 %v349_v4, %v3651_v5  ;;  %2624 = vmatprep.mubr.f32.mxu1 %v567_v8  ;;  %2793 = vmatmul.mubr.f32.gmra.mrb[8].mxu0 %v575_v9  ;;  %v280_v12 = vpop.trf.xlu0  ;;  %v576_v14 = vsub.f32 %v3647_v0, %v575_v9  ;;  %v3694_v9 = vpop.trf.xlu1 }
 0x105   : > { %v352_v19 = vsel %vm317_vm0, %v280_v12, 0 }
 0x106   : > { %4147 = vst [vmem:[#allocation13_spill] sm:$0xff] %v3655_v11  ;;  %v3661_v21 = vand.u32 4294901760, %v352_v19  ;;  %v577_v22 = vand.u32 4294901760, %v576_v14  ;;  %v585_v23 = vand.u32 4294901760, %v3655_v11  ;;  %v376_v14 = vsel %vm317_vm0, %v3581_v61, 0 }
 0x108   : > { %v3665_v25 = vsub.f32 %v352_v19, %v3661_v21  ;;  %2625 = vmatmul.mubr.f32.gmra.mrb[8].mxu1 %v577_v22  ;;  %2795 = vmatprep.mubr.f32.mxu0 %v585_v23  ;;  %v281_v26 = vpop.trf.xlu0  ;;  %v586_v30 = vsub.f32 %v3655_v11, %v585_v23  ;;  %v3705_v23 = vsub.f32 %v367_v43, %v3686_v1  ;;  %v382_v43 = vsel %vm317_vm0, %v3602_v16, 0 }
 0x109   : > { %v355_v31 = vsel %vm317_vm0, %v281_v26, 0  ;;  %v3707_v26 = vand.u32 4294901760, %v373_v33 }
 0x10a   : > { %4148 = vst [vmem:[#allocation14_spill] sm:$0xff] %v3665_v25  ;;  %v3669_v32 = vand.u32 4294901760, %v355_v31  ;;  %v587_v36 = vand.u32 4294901760, %v586_v30  ;;  %v595_v38 = vand.u32 4294901760, %v3665_v25  ;;  %4151 = vst [vmem:[#allocation17_spill] sm:$0xff] %v3705_v23  ;;  %v379_v30 = vsel %vm317_vm0, %v3591_v6, 0 }
 0x10b   : > { %v385_v6 = vsel %vm317_vm0, %v3616_v27, 0 }
 0x10c   : > { %v3677_v46 = vsub.f32 %v355_v31, %v3669_v32  ;;  %2627 = vmatprep.mubr.f32.mxu1 %v587_v36  ;;  %2796 = vmatmul.mubr.f32.gmra.mrb[10].mxu0 %v595_v38  ;;  %v282_v48 = vpop.trf.xlu0  ;;  %v596_v50 = vsub.f32 %v3665_v25, %v595_v38  ;;  %v3716_v38 = vsub.f32 %v370_v55, %v3696_v40  ;;  %v3731_v55 = vand.u32 4294901760, %v379_v30 }
 0x10d   : > { %v358_v54 = vsel %vm317_vm0, %v282_v48, 0  ;;  %v3718_v48 = vand.u32 4294901760, %v376_v14 }
 0x10e   : > { %4149 = vst [vmem:[#allocation15_spill] sm:$0xff] %v3677_v46  ;;  %v3683_v56 = vand.u32 4294901760, %v358_v54  ;;  %v597_v59 = vand.u32 4294901760, %v596_v50  ;;  %v605_v60 = vand.u32 4294901760, %v3677_v46  ;;  %4153 = vst [vmem:[#allocation19_spill] sm:$0xff] %v3716_v38 }
 0x110   : > { %v3691_v3 = vsub.f32 %v358_v54, %v3683_v56  ;;  %2628 = vmatmul.mubr.f32.gmra.mrb[10].mxu1 %v597_v59  ;;  %2798 = vmatprep.mubr.f32.mxu0 %v605_v60  ;;  %v283_v4 = vpop.trf.xlu0  ;;  %v606_v8 = vsub.f32 %v3677_v46, %v605_v60 }
 0x111   : > { %v361_v12 = vsel %vm317_vm0, %v283_v4, 0  ;;  %v313_v4 = vpop.trf.xlu1 }
 0x112   : > { %4150 = vst [vmem:[#allocation16_spill] sm:$0xff] %v3691_v3  ;;  %v3701_v19 = vand.u32 4294901760, %v361_v12  ;;  %v607_v49 = vand.u32 4294901760, %v606_v8  ;;  %v615_v22 = vand.u32 4294901760, %v3691_v3  ;;  %v3729_v8 = vsub.f32 %v373_v33, %v3707_v26 }
 0x113   : > { %v3744_v33 = vsub.f32 %v376_v14, %v3718_v48 }
 0x114   : > { %v3712_v31 = vsub.f32 %v361_v12, %v3701_v19  ;;  %2630 = vmatprep.mubr.f32.mxu1 %v607_v49  ;;  %2799 = vmatmul.mubr.f32.gmra.mrb[12].mxu0 %v615_v22  ;;  %v284_v36 = vpop.trf.xlu0  ;;  %v616_v61 = vsub.f32 %v3691_v3, %v615_v22  ;;  %4154 = vst [vmem:[#allocation20_spill] sm:$0xff] %v3729_v8  ;;  %v645_v12 = vand.u32 4294901760, %v3705_v23  ;;  %v3738_v49 = vand.u32 4294901760, %v382_v43 }
 0x115   : > { %v364_v50 = vsel %vm317_vm0, %v284_v36, 0  ;;  %v3740_v22 = vand.u32 4294901760, %v385_v6  ;;  %v655_v36 = vand.u32 4294901760, %v3716_v38  ;;  %4156 = vst [vmem:[#allocation22_spill] sm:$0xff] %v3744_v33  ;;  %v665_v46 = vand.u32 4294901760, %v3729_v8  ;;  %v314_v25 = vpop.trf.xlu1 }
 0x116   : > { %4152 = vst [vmem:[#allocation18_spill] sm:$0xff] %v3712_v31  ;;  %v3725_v54 = vand.u32 4294901760, %v364_v50  ;;  %v617_v59 = vand.u32 4294901760, %v616_v61  ;;  %v625_v60 = vand.u32 4294901760, %v3712_v31  ;;  %v388_v61 = vsel %vm317_vm0, %v3630_v44, 0 }
 0x117   : > { %v3758_v44 = vsub.f32 %v382_v43, %v3738_v49  ;;  %v666_v43 = vsub.f32 %v3729_v8, %v665_v46 }
 0x118   : > { %v3735_v16 = vsub.f32 %v364_v50, %v3725_v54  ;;  %2631 = vmatmul.mubr.f32.gmra.mrb[12].mxu1 %v617_v59  ;;  %2801 = vmatprep.mubr.f32.mxu0 %v625_v60  ;;  %v626_v27 = vsub.f32 %v3712_v31, %v625_v60  ;;  %v3750_v59 = vsub.f32 %v379_v30, %v3731_v55  ;;  %v391_v60 = vsel %vm317_vm0, %v3644_v63, 0 }
 0x119   : > { %v646_v31 = vsub.f32 %v3705_v23, %v645_v12  ;;  %4158 = vst [vmem:[#allocation24_spill] sm:$0xff] %v3758_v44  ;;  %v3763_v30 = vand.u32 4294901760, %v388_v61  ;;  %v3765_v11 = vand.u32 4294901760, %v391_v60  ;;  %v656_v23 = vsub.f32 %v3716_v38, %v655_v36 }
 0x11a   : > { %4155 = vst [vmem:[#allocation21_spill] sm:$0xff] %v3735_v16  ;;  %v627_v3 = vand.u32 4294901760, %v626_v27  ;;  %v635_v50 = vand.u32 4294901760, %v3735_v16  ;;  %4157 = vst [vmem:[#allocation23_spill] sm:$0xff] %v3750_v59  ;;  %v3761_v27 = vsub.f32 %v385_v6, %v3740_v22  ;;  %v685_v0 = vand.u32 4294901760, %v3750_v59 }
 0x11b   : > { %v397_v6 = vsel %vm317_vm0, %v3672_v41, 0  ;;  %v657_v8 = vand.u32 4294901760, %v656_v23  ;;  %v315_v41 = vpop.trf.xlu1 }
 0x11c   : > { %2633 = vmatprep.mubr.f32.mxu1 %v627_v3  ;;  %2802 = vmatmul.mubr.f32.gmra.mrb[14].mxu0 %v635_v50  ;;  %v636_v14 = vsub.f32 %v3735_v16, %v635_v50  ;;  %4159 = vst [vmem:[#allocation25_spill] sm:$0xff] %v3761_v27  ;;  %v675_v3 = vand.u32 4294901760, %v3744_v33  ;;  %v394_v50 = vsel %vm317_vm0, %v3658_v18, 0  ;;  %v647_v16 = vand.u32 4294901760, %v646_v31 }
 0x11d   : > { %2804 = vmatprep.mubr.f32.mxu0 %v645_v12  ;;  %v3776_v12 = vsub.f32 %v388_v61, %v3763_v30  ;;  %v705_v38 = vand.u32 4294901760, %v3761_v27  ;;  %v3781_v18 = vsub.f32 %v391_v60, %v3765_v11  ;;  %v3783_v31 = vand.u32 4294901760, %v394_v50 }
 0x11e   : > { %v637_v63 = vand.u32 4294901760, %v636_v14  ;;  %v695_v14 = vand.u32 4294901760, %v3758_v44  ;;  %v676_v51 = vsub.f32 %v3744_v33, %v675_v3  ;;  %v403_v61 = vsel %vm317_vm0, %v313_v4, 0 }
 0x11f   : > { %4160 = vst [vmem:[#allocation26_spill] sm:$0xff] %v3781_v18  ;;  %v715_v23 = vand.u32 4294901760, %v3776_v12  ;;  %v706_v33 = vsub.f32 %v3761_v27, %v705_v38  ;;  %v3796_v39 = vsub.f32 %v394_v50, %v3783_v31  ;;  %v316_v27 = vpop.trf.xlu1 }
 0x120   : > { %2634 = vmatmul.mubr.f32.gmra.mrb[14].mxu1 %v637_v63  ;;  %2805 = vmatmul.mubr.f32.gmra.mrb[16].mxu0 %v655_v36  ;;  %v3786_v63 = vand.u32 4294901760, %v397_v6  ;;  %v400_v36 = vsel %vm317_vm0, %v3694_v9, 0  ;;  %v696_v60 = vsub.f32 %v3758_v44, %v695_v14  ;;  %v677_v9 = vand.u32 4294901760, %v676_v51 }
 0x121   : > { %2636 = vmatprep.mubr.f32.mxu1 %v647_v16  ;;  %2807 = vmatprep.mubr.f32.mxu0 %v665_v46  ;;  %v667_v16 = vand.u32 4294901760, %v666_v43  ;;  %v686_v46 = vsub.f32 %v3750_v59, %v685_v0  ;;  %v3798_v29 = vand.u32 4294901760, %v400_v36  ;;  %v725_v43 = vand.u32 4294901760, %v3781_v18 }
 0x122   : > { %v3802_v4 = vsub.f32 %v397_v6, %v3786_v63  ;;  %v697_v50 = vand.u32 4294901760, %v696_v60  ;;  %v707_v44 = vand.u32 4294901760, %v706_v33  ;;  %v716_v51 = vsub.f32 %v3776_v12, %v715_v23 }
 0x123   : > { %v3810_v59 = vsub.f32 %v400_v36, %v3798_v29  ;;  %v735_v20 = vand.u32 4294901760, %v3796_v39 }
 0x124   : > { %2637 = vmatmul.mubr.f32.gmra.mrb[16].mxu1 %v657_v8  ;;  %2808 = vmatmul.mubr.f32.gmra.mrb[18].mxu0 %v675_v3  ;;  %v3804_v8 = vand.u32 4294901760, %v403_v61  ;;  %v687_v3 = vand.u32 4294901760, %v686_v46  ;;  %v745_v33 = vand.u32 4294901760, %v3802_v4  ;;  %v717_v36 = vand.u32 4294901760, %v716_v51 }
 0x125   : > { %2639 = vmatprep.mubr.f32.mxu1 %v667_v16  ;;  %2810 = vmatprep.mubr.f32.mxu0 %v685_v0  ;;  %v406_v0 = vsel %vm317_vm0, %v314_v25, 0  ;;  %v409_v16 = vsel %vm317_vm0, %v315_v41, 0  ;;  %v726_v25 = vsub.f32 %v3781_v18, %v725_v43 }
 0x126   : > { %v3812_v6 = vand.u32 4294901760, %v406_v0  ;;  %v3819_v41 = vand.u32 4294901760, %v409_v16  ;;  %v746_v18 = vsub.f32 %v3802_v4, %v745_v33 }
 0x128   : > { %2640 = vmatmul.mubr.f32.gmra.mrb[18].mxu1 %v677_v9  ;;  %2811 = vmatmul.mubr.f32.gmra.mrb[20].mxu0 %v695_v14  ;;  %v3817_v14 = vsub.f32 %v403_v61, %v3804_v8  ;;  %v3824_v46 = vsub.f32 %v406_v0, %v3812_v6  ;;  %v736_v9 = vsub.f32 %v3796_v39, %v735_v20  ;;  %v755_v61 = vand.u32 4294901760, %v3810_v59 }
 0x129   : > { %2642 = vmatprep.mubr.f32.mxu1 %v687_v3  ;;  %2813 = vmatprep.mubr.f32.mxu0 %v705_v38  ;;  %v412_v38 = vsel %vm317_vm0, %v316_v27, 0  ;;  %v3831_v3 = vsub.f32 %v409_v16, %v3819_v41  ;;  %v727_v27 = vand.u32 4294901760, %v726_v25  ;;  %v747_v51 = vand.u32 4294901760, %v746_v18 }
 0x12a   : > { %4161 = vst [vmem:[#allocation27_spill] sm:$0xff] %v3817_v14  ;;  %v3826_v60 = vand.u32 4294901760, %v412_v38  ;;  %v756_v0 = vsub.f32 %v3810_v59, %v755_v61 }
 0x12b   : > { %v785_v25 = vand.u32 4294901760, %v3831_v3 }
 0x12c   : > { %2643 = vmatmul.mubr.f32.gmra.mrb[20].mxu1 %v697_v50  ;;  %2814 = vmatmul.mubr.f32.gmra.mrb[22].mxu0 %v715_v23  ;;  %v765_v23 = vand.u32 4294901760, %v3817_v14  ;;  %v775_v50 = vand.u32 4294901760, %v3824_v46 }
 0x12d   : > { %2645 = vmatprep.mubr.f32.mxu1 %v707_v44  ;;  %2816 = vmatprep.mubr.f32.mxu0 %v725_v43  ;;  %v3836_v44 = vsub.f32 %v412_v38, %v3826_v60  ;;  %v737_v43 = vand.u32 4294901760, %v736_v9  ;;  %v786_v9 = vsub.f32 %v3831_v3, %v785_v25 }
 0x12e   : > { %v766_v16 = vsub.f32 %v3817_v14, %v765_v23 }
 0x12f   : > { %v795_v38 = vand.u32 4294901760, %v3836_v44  ;;  %v787_v14 = vand.u32 4294901760, %v786_v9 }
 0x130   : > { %2646 = vmatmul.mubr.f32.gmra.mrb[22].mxu1 %v717_v36  ;;  %2817 = vmatmul.mubr.f32.gmra.mrb[24].mxu0 %v735_v20  ;;  %v757_v20 = vand.u32 4294901760, %v756_v0  ;;  %v767_v36 = vand.u32 4294901760, %v766_v16 }
 0x131   : > { %2648 = vmatprep.mubr.f32.mxu1 %v727_v27  ;;  %2819 = vmatprep.mubr.f32.mxu0 %v745_v33  ;;  %v776_v33 = vsub.f32 %v3824_v46, %v775_v50  ;;  %v796_v27 = vsub.f32 %v3836_v44, %v795_v38 }
 0x133   : > { %v777_v18 = vand.u32 4294901760, %v776_v33 }
 0x134   : > { %2649 = vmatmul.mubr.f32.gmra.mrb[24].mxu1 %v737_v43  ;;  %2820 = vmatmul.mubr.f32.gmra.mrb[26].mxu0 %v755_v61  ;;  %v797_v61 = vand.u32 4294901760, %v796_v27 }
 0x135   : > { %2651 = vmatprep.mubr.f32.mxu1 %v747_v51  ;;  %2822 = vmatprep.mubr.f32.mxu0 %v765_v23 }
 0x138   : > { %2652 = vmatmul.mubr.f32.gmra.mrb[26].mxu1 %v757_v20  ;;  %2823 = vmatmul.mubr.f32.gmra.mrb[28].mxu0 %v775_v50 }
 0x139   : > { %2654 = vmatprep.mubr.f32.mxu1 %v767_v36  ;;  %2825 = vmatprep.mubr.f32.mxu0 %v785_v25 }
 0x13c   : > { %2655 = vmatmul.mubr.f32.gmra.mrb[28].mxu1 %v777_v18  ;;  %2826 = vmatmul.mubr.f32.gmra.mrb[30].mxu0 %v795_v38 }
 0x13d   : > { %2657 = vmatprep.mubr.f32.mxu1 %v787_v14  ;;  %2836 = vmatprep.mubr.f32.mxu0 %v3553_v35 }
 0x140   : > { %2658 = vmatmul.mubr.f32.gmra.mrb[30].mxu1 %v797_v61  ;;  %2837 = vmatmul.mubr.f32.vlgmr.msra.gmra.mrb[0].mxu0 %v3561_v42 }
 0x141   : > { %2668 = vmatprep.mubr.f32.mxu1 %v3553_v35  ;;  %2839 = vmatprep.mubr.f32.mxu0 %v3573_v53 }
 0x142   : > { %2983 = vmatpush3.bf16.msra.mxu0 %v3533_v13  ;;  %v4162_v13 = vld [vmem:[#allocation8_spill] sm:$0xff] }
 0x143   : > { %2985 = vmatprep.subr.bf16.mxu0 %v3536_v15 }
 0x144   : > { %2669 = vmatmul.mubr.f32.vlgmr.msra.gmra.mrb[0].mxu1 %v3561_v42  ;;  %2840 = vmatmul.mubr.f32.gmra.mrb[2].mxu0 %v3583_v62 }
 0x145   : > { %2959 = vmatpush3.bf16.msra.mxu1 %v3548_v28  ;;  %2671 = vmatprep.mubr.f32.mxu1 %v3573_v53  ;;  %v4164_v28 = vld [vmem:[#allocation10_spill] sm:$0xff] }
 0x146   : > { %2842 = vmatprep.mubr.f32.mxu0 %v3593_v7  ;;  %2961 = vmatprep.subr.bf16.mxu1 %v3571_v52 }
 0x147   : > { %2987 = vmatpush3.bf16.msra.mxu0 %v3536_v15  ;;  %v4163_v15 = vld [vmem:[#allocation9_spill] sm:$0xff] }
 0x148   : > { %2672 = vmatmul.mubr.f32.gmra.mrb[2].mxu1 %v3583_v62  ;;  %2843 = vmatmul.mubr.f32.gmra.mrb[4].mxu0 %v3604_v17 }
 0x149   : > { %2674 = vmatprep.mubr.f32.mxu1 %v3593_v7  ;;  %2845 = vmatprep.mubr.f32.mxu0 %v3613_v24 }
 0x14a   : > { %2963 = vmatpush3.bf16.msra.mxu1 %v3571_v52  ;;  %v4169_v52 = vld [vmem:[#allocation15_spill] sm:$0xff] }
 0x14c   : > { %2675 = vmatmul.mubr.f32.gmra.mrb[4].mxu1 %v3604_v17  ;;  %2846 = vmatmul.mubr.f32.gmra.mrb[6].mxu0 %v3623_v34 }
 0x14d   : > { %2677 = vmatprep.mubr.f32.mxu1 %v3613_v24  ;;  %2848 = vmatprep.mubr.f32.mxu0 %v3633_v47 }
 0x150   : > { %2678 = vmatmul.mubr.f32.gmra.mrb[6].mxu1 %v3623_v34  ;;  %2849 = vmatmul.mubr.f32.gmra.mrb[8].mxu0 %v3641_v58 }
 0x151   : > { %2680 = vmatprep.mubr.f32.mxu1 %v3633_v47  ;;  %2851 = vmatprep.mubr.f32.mxu0 %v3651_v5 }
 0x154   : > { %2681 = vmatmul.mubr.f32.gmra.mrb[8].mxu1 %v3641_v58  ;;  %2852 = vmatmul.mubr.f32.gmra.mrb[10].mxu0 %v3661_v21 }
 0x155   : > { %2683 = vmatprep.mubr.f32.mxu1 %v3651_v5  ;;  %2854 = vmatprep.mubr.f32.mxu0 %v3669_v32 }
 0x158   : > { %2684 = vmatmul.mubr.f32.gmra.mrb[10].mxu1 %v3661_v21  ;;  %2855 = vmatmul.mubr.f32.gmra.mrb[12].mxu0 %v3683_v56 }
 0x159   : > { %2686 = vmatprep.mubr.f32.mxu1 %v3669_v32  ;;  %2857 = vmatprep.mubr.f32.mxu0 %v3701_v19 }
 0x15c   : > { %2687 = vmatmul.mubr.f32.gmra.mrb[12].mxu1 %v3683_v56  ;;  %2858 = vmatmul.mubr.f32.gmra.mrb[14].mxu0 %v3725_v54 }
 0x15d   : > { %2689 = vmatprep.mubr.f32.mxu1 %v3701_v19  ;;  %2860 = vmatprep.mubr.f32.mxu0 %v3686_v1 }
 0x160   : > { %2690 = vmatmul.mubr.f32.gmra.mrb[14].mxu1 %v3725_v54  ;;  %2861 = vmatmul.mubr.f32.gmra.mrb[16].mxu0 %v3696_v40 }
 0x161   : > { %2692 = vmatprep.mubr.f32.mxu1 %v3686_v1  ;;  %2863 = vmatprep.mubr.f32.mxu0 %v3707_v26 }
 0x164   : > { %2693 = vmatmul.mubr.f32.gmra.mrb[16].mxu1 %v3696_v40  ;;  %2864 = vmatmul.mubr.f32.gmra.mrb[18].mxu0 %v3718_v48 }
 0x165   : > { %2695 = vmatprep.mubr.f32.mxu1 %v3707_v26  ;;  %2866 = vmatprep.mubr.f32.mxu0 %v3731_v55 }
 0x168   : > { %2696 = vmatmul.mubr.f32.gmra.mrb[18].mxu1 %v3718_v48  ;;  %2867 = vmatmul.mubr.f32.gmra.mrb[20].mxu0 %v3738_v49 }
 0x169   : > { %2698 = vmatprep.mubr.f32.mxu1 %v3731_v55  ;;  %2869 = vmatprep.mubr.f32.mxu0 %v3740_v22 }
 0x16c   : > { %2699 = vmatmul.mubr.f32.gmra.mrb[20].mxu1 %v3738_v49  ;;  %2870 = vmatmul.mubr.f32.gmra.mrb[22].mxu0 %v3763_v30 }
 0x16d   : > { %2701 = vmatprep.mubr.f32.mxu1 %v3740_v22  ;;  %2872 = vmatprep.mubr.f32.mxu0 %v3765_v11 }
 0x170   : > { %2702 = vmatmul.mubr.f32.gmra.mrb[22].mxu1 %v3763_v30  ;;  %2873 = vmatmul.mubr.f32.gmra.mrb[24].mxu0 %v3783_v31 }
 0x171   : > { %2704 = vmatprep.mubr.f32.mxu1 %v3765_v11  ;;  %2875 = vmatprep.mubr.f32.mxu0 %v3786_v63 }
 0x174   : > { %2705 = vmatmul.mubr.f32.gmra.mrb[24].mxu1 %v3783_v31  ;;  %2876 = vmatmul.mubr.f32.gmra.mrb[26].mxu0 %v3798_v29 }
 0x175   : > { %2707 = vmatprep.mubr.f32.mxu1 %v3786_v63  ;;  %2878 = vmatprep.mubr.f32.mxu0 %v3804_v8 }
 0x178   : > { %2708 = vmatmul.mubr.f32.gmra.mrb[26].mxu1 %v3798_v29  ;;  %2879 = vmatmul.mubr.f32.gmra.mrb[28].mxu0 %v3812_v6 }
 0x179   : > { %2710 = vmatprep.mubr.f32.mxu1 %v3804_v8  ;;  %2881 = vmatprep.mubr.f32.mxu0 %v3819_v41 }
 0x17c   : > { %2711 = vmatmul.mubr.f32.gmra.mrb[28].mxu1 %v3812_v6  ;;  %2882 = vmatmul.mubr.f32.gmra.mrb[30].mxu0 %v3826_v60 }
 0x17d   : > { %2713 = vmatprep.mubr.f32.mxu1 %v3819_v41  ;;  %2892 = vmatprep.mubr.f32.mxu0 %v3553_v35  ;;  %v4165_v35 = vld [vmem:[#allocation11_spill] sm:$0xff] }
 0x180   : > { %2714 = vmatmul.mubr.f32.gmra.mrb[30].mxu1 %v3826_v60  ;;  %2893 = vmatmul.mubr.f32.vlgmr.msra.gmra.mrb[0].mxu0 %v3561_v42  ;;  %v4167_v42 = vld [vmem:[#allocation13_spill] sm:$0xff] }
 0x181   : > { %2724 = vmatprep.mubr.f32.mxu1 %v3556_v37  ;;  %2895 = vmatprep.mubr.f32.mxu0 %v3573_v53  ;;  %v4166_v37 = vld [vmem:[#allocation12_spill] sm:$0xff] }
 0x182   : > { %v4170_v53 = vld [vmem:[#allocation16_spill] sm:$0xff] }
 0x184   : > { %2725 = vmatmul.mubr.f32.vlgmr.msra.gmra.mrb[0].mxu1 %v3565_v45  ;;  %2896 = vmatmul.mubr.f32.gmra.mrb[2].mxu0 %v3583_v62  ;;  %v4168_v45 = vld [vmem:[#allocation14_spill] sm:$0xff]  ;;  %v4172_v62 = vld [vmem:[#allocation21_spill] sm:$0xff] }
 0x185   : > { %2727 = vmatprep.mubr.f32.mxu1 %v3577_v57  ;;  %2898 = vmatprep.mubr.f32.mxu0 %v3593_v7  ;;  %v4171_v57 = vld [vmem:[#allocation18_spill] sm:$0xff]  ;;  %v4174_v7 = vld [vmem:[#allocation19_spill] sm:$0xff] }
 0x188   : > { %2728 = vmatmul.mubr.f32.gmra.mrb[2].mxu1 %v3587_v2  ;;  %2899 = vmatmul.mubr.f32.gmra.mrb[4].mxu0 %v3604_v17  ;;  %v4173_v2 = vld [vmem:[#allocation17_spill] sm:$0xff]  ;;  %v4176_v17 = vld [vmem:[#allocation22_spill] sm:$0xff] }
 0x189   : > { %2730 = vmatprep.mubr.f32.mxu1 %v3598_v10  ;;  %2901 = vmatprep.mubr.f32.mxu0 %v3613_v24  ;;  %v4175_v10 = vld [vmem:[#allocation20_spill] sm:$0xff]  ;;  %v4177_v24 = vld [vmem:[#allocation23_spill] sm:$0xff] }
 0x18c   : > { %2731 = vmatmul.mubr.f32.gmra.mrb[4].mxu1 %v4162_v13  ;;  %2902 = vmatmul.mubr.f32.gmra.mrb[6].mxu0 %v3623_v34  ;;  %v4178_v34 = vld [vmem:[#allocation24_spill] sm:$0xff] }
 0x18d   : > { %2733 = vmatprep.mubr.f32.mxu1 %v4163_v15  ;;  %2904 = vmatprep.mubr.f32.mxu0 %v3633_v47  ;;  %v4179_v47 = vld [vmem:[#allocation25_spill] sm:$0xff] }
 0x190   : > { %2734 = vmatmul.mubr.f32.gmra.mrb[6].mxu1 %v4164_v28  ;;  %2905 = vmatmul.mubr.f32.gmra.mrb[8].mxu0 %v3641_v58  ;;  %v4180_v58 = vld [vmem:[#allocation26_spill] sm:$0xff] }
 0x191   : > { %2736 = vmatprep.mubr.f32.mxu1 %v4165_v35  ;;  %2907 = vmatprep.mubr.f32.mxu0 %v3651_v5  ;;  %v4181_v5 = vld [vmem:[#allocation27_spill] sm:$0xff] }
 0x194   : > { %2737 = vmatmul.mubr.f32.gmra.mrb[8].mxu1 %v4166_v37  ;;  %2908 = vmatmul.mubr.f32.gmra.mrb[10].mxu0 %v3661_v21 }
 0x195   : > { %2739 = vmatprep.mubr.f32.mxu1 %v4167_v42  ;;  %2910 = vmatprep.mubr.f32.mxu0 %v3669_v32 }
 0x198   : > { %2740 = vmatmul.mubr.f32.gmra.mrb[10].mxu1 %v4168_v45  ;;  %2911 = vmatmul.mubr.f32.gmra.mrb[12].mxu0 %v3683_v56 }
 0x199   : > { %2742 = vmatprep.mubr.f32.mxu1 %v4169_v52  ;;  %2913 = vmatprep.mubr.f32.mxu0 %v3701_v19 }
 0x19c   : > { %2743 = vmatmul.mubr.f32.gmra.mrb[12].mxu1 %v4170_v53  ;;  %2914 = vmatmul.mubr.f32.gmra.mrb[14].mxu0 %v3725_v54 }
 0x19d   : > { %2745 = vmatprep.mubr.f32.mxu1 %v4171_v57  ;;  %2916 = vmatprep.mubr.f32.mxu0 %v3686_v1 }
 0x1a0   : > { %2746 = vmatmul.mubr.f32.gmra.mrb[14].mxu1 %v4172_v62  ;;  %2917 = vmatmul.mubr.f32.gmra.mrb[16].mxu0 %v3696_v40 }
 0x1a1   : > { %2748 = vmatprep.mubr.f32.mxu1 %v4173_v2  ;;  %2919 = vmatprep.mubr.f32.mxu0 %v3707_v26 }
 0x1a4   : > { %2749 = vmatmul.mubr.f32.gmra.mrb[16].mxu1 %v4174_v7  ;;  %2920 = vmatmul.mubr.f32.gmra.mrb[18].mxu0 %v3718_v48 }
 0x1a5   : > { %2751 = vmatprep.mubr.f32.mxu1 %v4175_v10  ;;  %2922 = vmatprep.mubr.f32.mxu0 %v3731_v55 }
 0x1a8   : > { %2752 = vmatmul.mubr.f32.gmra.mrb[18].mxu1 %v4176_v17  ;;  %2923 = vmatmul.mubr.f32.gmra.mrb[20].mxu0 %v3738_v49 }
 0x1a9   : > { %2754 = vmatprep.mubr.f32.mxu1 %v4177_v24  ;;  %2925 = vmatprep.mubr.f32.mxu0 %v3740_v22 }
 0x1ac   : > { %2755 = vmatmul.mubr.f32.gmra.mrb[20].mxu1 %v4178_v34  ;;  %2926 = vmatmul.mubr.f32.gmra.mrb[22].mxu0 %v3763_v30 }
 0x1ad   : > { %2757 = vmatprep.mubr.f32.mxu1 %v4179_v47  ;;  %2928 = vmatprep.mubr.f32.mxu0 %v3765_v11  ;;  %v3985_v11 = vld [vmem:[%s4108_s2] ss:$0 sm:$0xff] }
 0x1b0   : > { %2758 = vmatmul.mubr.f32.gmra.mrb[22].mxu1 %v3776_v12  ;;  %2929 = vmatmul.mubr.f32.gmra.mrb[24].mxu0 %v3783_v31 }
 0x1b1   : > { %2760 = vmatprep.mubr.f32.mxu1 %v4180_v58  ;;  %2931 = vmatprep.mubr.f32.mxu0 %v3786_v63 }
 0x1b4   : > { %2761 = vmatmul.mubr.f32.gmra.mrb[24].mxu1 %v3796_v39  ;;  %2932 = vmatmul.mubr.f32.gmra.mrb[26].mxu0 %v3798_v29 }
 0x1b5   : > { %2763 = vmatprep.mubr.f32.mxu1 %v3802_v4  ;;  %2934 = vmatprep.mubr.f32.mxu0 %v3804_v8 }
 0x1b8   : > { %2764 = vmatmul.mubr.f32.gmra.mrb[26].mxu1 %v3810_v59  ;;  %2935 = vmatmul.mubr.f32.gmra.mrb[28].mxu0 %v3812_v6 }
 0x1b9   : > { %2766 = vmatprep.mubr.f32.mxu1 %v4181_v5  ;;  %2937 = vmatprep.mubr.f32.mxu0 %v3819_v41 }
 0x1bc   : > { %2767 = vmatmul.mubr.f32.gmra.mrb[28].mxu1 %v3824_v46  ;;  %2938 = vmatmul.mubr.f32.gmra.mrb[30].mxu0 %v3826_v60 }
 0x1bd   : > { %2769 = vmatprep.mubr.f32.mxu1 %v3831_v3 }
 0x1c0   : > { %2770 = vmatmul.mubr.f32.gmra.mrb[30].mxu1 %v3836_v44 }
 0x253   : > { %v2894_v29 = vpop.f32.mrb[0].mxu0 }
 0x254   : > { %v2042_v39 = vpop.f32.mrb[1].mxu0 }
 0x257   : > { %v2726_v21 = vpop.f32.mrb[0].mxu1  ;;  %v2897_v32 = vpop.f32.mrb[2].mxu0 }
 0x258   : > { %v2988_v56 = vadd.f32 %v2726_v21, %v3985_v11  ;;  %v1156_v1 = vpop.f32.mrb[1].mxu1  ;;  %v2054_v40 = vpop.f32.mrb[3].mxu0 }
 0x259   : > { %v2990_v19 = vadd.f32 %v3985_v11, %v1156_v1 }
 0x25a   : > { %v2989_v26 = vadd.f32 %v2988_v56, %v2894_v29 }
 0x25b   : > { %v2991_v48 = vadd.f32 %v2990_v19, %v2042_v39  ;;  %v2729_v54 = vpop.f32.mrb[2].mxu1  ;;  %v2900_v55 = vpop.f32.mrb[4].mxu0 }
 0x25c   : > { %2234 = vst.msk [vmem:[%s3991_s4 + $0x8] sm:$0xff] %vm2232_vm1, %v2989_v26  ;;  %v2992_v49 = vadd.f32 %v2729_v54, %v3985_v11  ;;  %v1170_v22 = vpop.f32.mrb[3].mxu1  ;;  %v2066_v59 = vpop.f32.mrb[5].mxu0 }
 0x25d   : > { %2233 = vst.msk [vmem:[%s3991_s4] sm:$0xff] %vm2232_vm1, %v2991_v48  ;;  %v2994_v30 = vadd.f32 %v3985_v11, %v1170_v22 }
 0x25e   : > { %v2993_v12 = vadd.f32 %v2992_v49, %v2897_v32 }
 0x25f   : > { %v2995_v31 = vadd.f32 %v2994_v30, %v2054_v40  ;;  %v2732_v63 = vpop.f32.mrb[4].mxu1  ;;  %v2903_v4 = vpop.f32.mrb[6].mxu0 }
 0x260   : > { %2236 = vst.msk [vmem:[%s3991_s4 + $0x18] sm:$0xff] %vm2232_vm1, %v2993_v12  ;;  %v2996_v8 = vadd.f32 %v2732_v63, %v3985_v11  ;;  %v1184_v6 = vpop.f32.mrb[5].mxu1  ;;  %v2078_v14 = vpop.f32.mrb[7].mxu0 }
 0x261   : > { %2235 = vst.msk [vmem:[%s3991_s4 + $0x10] sm:$0xff] %vm2232_vm1, %v2995_v31  ;;  %v2998_v41 = vadd.f32 %v3985_v11, %v1184_v6 }
 0x262   : > { %v2997_v46 = vadd.f32 %v2996_v8, %v2900_v55 }
 0x263   : > { %v2999_v60 = vadd.f32 %v2998_v41, %v2066_v59  ;;  %v2735_v3 = vpop.f32.mrb[6].mxu1  ;;  %v2906_v23 = vpop.f32.mrb[8].mxu0 }
 0x264   : > { %2238 = vst.msk [vmem:[%s3991_s4 + $0x28] sm:$0xff] %vm2232_vm1, %v2997_v46  ;;  %v3000_v44 = vadd.f32 %v2735_v3, %v3985_v11  ;;  %v1198_v43 = vpop.f32.mrb[7].mxu1  ;;  %v2090_v0 = vpop.f32.mrb[9].mxu0 }
 0x265   : > { %2237 = vst.msk [vmem:[%s3991_s4 + $0x20] sm:$0xff] %vm2232_vm1, %v2999_v60  ;;  %v3002_v50 = vadd.f32 %v3985_v11, %v1198_v43 }
 0x266   : > { %v3001_v51 = vadd.f32 %v3000_v44, %v2903_v4 }
 0x267   : > { %v3003_v16 = vadd.f32 %v3002_v50, %v2078_v14  ;;  %v2738_v25 = vpop.f32.mrb[8].mxu1  ;;  %v2909_v20 = vpop.f32.mrb[10].mxu0 }
 0x268   : > { %2240 = vst.msk [vmem:[%s3991_s4 + $0x38] sm:$0xff] %vm2232_vm1, %v3001_v51  ;;  %v3004_v33 = vadd.f32 %v2738_v25, %v3985_v11  ;;  %v1212_v38 = vpop.f32.mrb[9].mxu1  ;;  %v2102_v36 = vpop.f32.mrb[11].mxu0 }
 0x269   : > { %2239 = vst.msk [vmem:[%s3991_s4 + $0x30] sm:$0xff] %vm2232_vm1, %v3003_v16  ;;  %v3006_v9 = vadd.f32 %v3985_v11, %v1212_v38 }
 0x26a   : > { %v3005_v18 = vadd.f32 %v3004_v33, %v2906_v23 }
 0x26b   : > { %v3007_v27 = vadd.f32 %v3006_v9, %v2090_v0  ;;  %v2741_v61 = vpop.f32.mrb[10].mxu1  ;;  %v2912_v13 = vpop.f32.mrb[12].mxu0 }
 0x26c   : > { %2242 = vst.msk [vmem:[%s3991_s4 + $0x48] sm:$0xff] %vm2232_vm1, %v3005_v18  ;;  %v3008_v15 = vadd.f32 %v2741_v61, %v3985_v11  ;;  %v1226_v28 = vpop.f32.mrb[11].mxu1  ;;  %v2114_v35 = vpop.f32.mrb[13].mxu0 }
 0x26d   : > { %2241 = vst.msk [vmem:[%s3991_s4 + $0x40] sm:$0xff] %vm2232_vm1, %v3007_v27  ;;  %v3010_v37 = vadd.f32 %v3985_v11, %v1226_v28 }
 0x26e   : > { %v3009_v42 = vadd.f32 %v3008_v15, %v2909_v20 }
 0x26f   : > { %v3011_v45 = vadd.f32 %v3010_v37, %v2102_v36  ;;  %v2744_v52 = vpop.f32.mrb[12].mxu1  ;;  %v2915_v53 = vpop.f32.mrb[14].mxu0 }
 0x270   : > { %2244 = vst.msk [vmem:[%s3991_s4 + $0x58] sm:$0xff] %vm2232_vm1, %v3009_v42  ;;  %v3012_v57 = vadd.f32 %v2744_v52, %v3985_v11  ;;  %v1240_v62 = vpop.f32.mrb[13].mxu1  ;;  %v2126_v2 = vpop.f32.mrb[15].mxu0 }
 0x271   : > { %2243 = vst.msk [vmem:[%s3991_s4 + $0x50] sm:$0xff] %vm2232_vm1, %v3011_v45  ;;  %v3014_v7 = vadd.f32 %v3985_v11, %v1240_v62 }
 0x272   : > { %v3013_v10 = vadd.f32 %v3012_v57, %v2912_v13 }
 0x273   : > { %v3015_v17 = vadd.f32 %v3014_v7, %v2114_v35  ;;  %v2747_v24 = vpop.f32.mrb[14].mxu1  ;;  %v2918_v34 = vpop.f32.mrb[16].mxu0 }
 0x274   : > { %2246 = vst.msk [vmem:[%s3991_s4 + $0x68] sm:$0xff] %vm2232_vm1, %v3013_v10  ;;  %v3016_v47 = vadd.f32 %v2747_v24, %v3985_v11  ;;  %v1254_v58 = vpop.f32.mrb[15].mxu1  ;;  %v2138_v5 = vpop.f32.mrb[17].mxu0 }
 0x275   : > { %2245 = vst.msk [vmem:[%s3991_s4 + $0x60] sm:$0xff] %vm2232_vm1, %v3015_v17  ;;  %v3018_v29 = vadd.f32 %v3985_v11, %v1254_v58 }
 0x276   : > { %v3017_v39 = vadd.f32 %v3016_v47, %v2915_v53 }
 0x277   : > { %v3019_v21 = vadd.f32 %v3018_v29, %v2126_v2  ;;  %v2750_v32 = vpop.f32.mrb[16].mxu1  ;;  %v2921_v56 = vpop.f32.mrb[18].mxu0 }
 0x278   : > { %2248 = vst.msk [vmem:[%s3991_s4 + $0x78] sm:$0xff] %vm2232_vm1, %v3017_v39  ;;  %v3020_v1 = vadd.f32 %v2750_v32, %v3985_v11  ;;  %v1268_v40 = vpop.f32.mrb[17].mxu1  ;;  %v2150_v19 = vpop.f32.mrb[19].mxu0 }
 0x279   : > { %2247 = vst.msk [vmem:[%s3991_s4 + $0x70] sm:$0xff] %vm2232_vm1, %v3019_v21  ;;  %v3022_v26 = vadd.f32 %v3985_v11, %v1268_v40 }
 0x27a   : > { %v3021_v48 = vadd.f32 %v3020_v1, %v2918_v34 }
 0x27b   : > { %v3023_v54 = vadd.f32 %v3022_v26, %v2138_v5  ;;  %v2753_v55 = vpop.f32.mrb[18].mxu1  ;;  %v2924_v49 = vpop.f32.mrb[20].mxu0 }
 0x27c   : > { %2250 = vst.msk [vmem:[%s3991_s4 + $0x88] sm:$0xff] %vm2232_vm1, %v3021_v48  ;;  %v3024_v22 = vadd.f32 %v2753_v55, %v3985_v11  ;;  %v1282_v59 = vpop.f32.mrb[19].mxu1  ;;  %v2162_v30 = vpop.f32.mrb[21].mxu0 }
 0x27d   : > { %2249 = vst.msk [vmem:[%s3991_s4 + $0x80] sm:$0xff] %vm2232_vm1, %v3023_v54  ;;  %v3026_v12 = vadd.f32 %v3985_v11, %v1282_v59 }
 0x27e   : > { %v3025_v31 = vadd.f32 %v3024_v22, %v2921_v56 }
 0x27f   : > { %v3027_v63 = vadd.f32 %v3026_v12, %v2150_v19  ;;  %v2756_v4 = vpop.f32.mrb[20].mxu1  ;;  %v2927_v8 = vpop.f32.mrb[22].mxu0 }
 0x280   : > { %2252 = vst.msk [vmem:[%s3991_s4 + $0x98] sm:$0xff] %vm2232_vm1, %v3025_v31  ;;  %v3028_v6 = vadd.f32 %v2756_v4, %v3985_v11  ;;  %v1296_v14 = vpop.f32.mrb[21].mxu1  ;;  %v2174_v41 = vpop.f32.mrb[23].mxu0 }
 0x281   : > { %2251 = vst.msk [vmem:[%s3991_s4 + $0x90] sm:$0xff] %vm2232_vm1, %v3027_v63  ;;  %v3030_v46 = vadd.f32 %v3985_v11, %v1296_v14 }
 0x282   : > { %v3029_v60 = vadd.f32 %v3028_v6, %v2924_v49 }
 0x283   : > { %v3031_v3 = vadd.f32 %v3030_v46, %v2162_v30  ;;  %v2759_v23 = vpop.f32.mrb[22].mxu1  ;;  %v2930_v44 = vpop.f32.mrb[24].mxu0 }
 0x284   : > { %2254 = vst.msk [vmem:[%s3991_s4 + $0xa8] sm:$0xff] %vm2232_vm1, %v3029_v60  ;;  %v3032_v43 = vadd.f32 %v2759_v23, %v3985_v11  ;;  %v1310_v0 = vpop.f32.mrb[23].mxu1  ;;  %v2186_v50 = vpop.f32.mrb[25].mxu0 }
 0x285   : > { %2253 = vst.msk [vmem:[%s3991_s4 + $0xa0] sm:$0xff] %vm2232_vm1, %v3031_v3  ;;  %v3034_v51 = vadd.f32 %v3985_v11, %v1310_v0 }
 0x286   : > { %v3033_v16 = vadd.f32 %v3032_v43, %v2927_v8 }
 0x287   : > { %v3035_v25 = vadd.f32 %v3034_v51, %v2174_v41  ;;  %v2762_v20 = vpop.f32.mrb[24].mxu1  ;;  %v2933_v33 = vpop.f32.mrb[26].mxu0 }
 0x288   : > { %2256 = vst.msk [vmem:[%s3991_s4 + $0xb8] sm:$0xff] %vm2232_vm1, %v3033_v16  ;;  %v3036_v38 = vadd.f32 %v2762_v20, %v3985_v11  ;;  %v1324_v36 = vpop.f32.mrb[25].mxu1  ;;  %v2198_v9 = vpop.f32.mrb[27].mxu0 }
 0x289   : > { %2255 = vst.msk [vmem:[%s3991_s4 + $0xb0] sm:$0xff] %vm2232_vm1, %v3035_v25  ;;  %v3038_v18 = vadd.f32 %v3985_v11, %v1324_v36 }
 0x28a   : > { %v3037_v27 = vadd.f32 %v3036_v38, %v2930_v44 }
 0x28b   : > { %v3039_v61 = vadd.f32 %v3038_v18, %v2186_v50  ;;  %v2765_v13 = vpop.f32.mrb[26].mxu1  ;;  %v2936_v15 = vpop.f32.mrb[28].mxu0 }
 0x28c   : > { %2258 = vst.msk [vmem:[%s3991_s4 + $0xc8] sm:$0xff] %vm2232_vm1, %v3037_v27  ;;  %v3040_v28 = vadd.f32 %v2765_v13, %v3985_v11  ;;  %v1338_v35 = vpop.f32.mrb[27].mxu1  ;;  %v2210_v37 = vpop.f32.mrb[29].mxu0 }
 0x28d   : > { %2257 = vst.msk [vmem:[%s3991_s4 + $0xc0] sm:$0xff] %vm2232_vm1, %v3039_v61  ;;  %v3042_v42 = vadd.f32 %v3985_v11, %v1338_v35 }
 0x28e   : > { %v3041_v45 = vadd.f32 %v3040_v28, %v2933_v33 }
 0x28f   : > { %v3043_v52 = vadd.f32 %v3042_v42, %v2198_v9  ;;  %v2768_v53 = vpop.f32.mrb[28].mxu1  ;;  %v2939_v57 = vpop.f32.mrb[30].mxu0 }
 0x290   : > { %2260 = vst.msk [vmem:[%s3991_s4 + $0xd8] sm:$0xff] %vm2232_vm1, %v3041_v45  ;;  %v3044_v62 = vadd.f32 %v2768_v53, %v3985_v11  ;;  %v1352_v2 = vpop.f32.mrb[29].mxu1  ;;  %v2222_v7 = vpop.f32.mrb[31].mxu0 }
 0x291   : > { %2259 = vst.msk [vmem:[%s3991_s4 + $0xd0] sm:$0xff] %vm2232_vm1, %v3043_v52  ;;  %v3046_v10 = vadd.f32 %v3985_v11, %v1352_v2 }
 0x292   : > { %v3045_v17 = vadd.f32 %v3044_v62, %v2936_v15 }
 0x293   : > { %v3047_v24 = vadd.f32 %v3046_v10, %v2210_v37  ;;  %v2771_v34 = vpop.f32.mrb[30].mxu1 }
 0x294   : > { %2262 = vst.msk [vmem:[%s3991_s4 + $0xe8] sm:$0xff] %vm2232_vm1, %v3045_v17  ;;  %v3048_v47 = vadd.f32 %v2771_v34, %v3985_v11  ;;  %v1366_v58 = vpop.f32.mrb[31].mxu1 }
 0x295   : > { %2261 = vst.msk [vmem:[%s3991_s4 + $0xe0] sm:$0xff] %vm2232_vm1, %v3047_v24  ;;  %v3050_v5 = vadd.f32 %v3985_v11, %v1366_v58 }
 0x296   : > { %v3049_v29 = vadd.f32 %v3048_v47, %v2939_v57 }
 0x297   : > { %v3051_v39 = vadd.f32 %v3050_v5, %v2222_v7 }
 0x298   : > { %2264 = vst.msk [vmem:[%s3991_s4 + $0xf8] sm:$0xff] %vm2232_vm1, %v3049_v29 }
 0x299   : > { %2263 = vst.msk [vmem:[%s3991_s4 + $0xf0] sm:$0xff] %vm2232_vm1, %v3051_v39 }
 0x29a PF: > { %s17_s17 = sadd.s32 1, %s3363_s17   ;;  %s4182_s12 = smov %s3347_s13 }
 0x29b   : > { %p14_p1 = scmp.ge.s32.totalorder %s17_s17, 4   ;;  %s4183_s13 = smov %s3351_s14 }
 0x29c   : > { %s4184_s14 = smov %s3474_s27  ;;  %s4185_s15 = smov %s3359_s16 }
 0x29d   : > { %s4186_s16 = smov %s4188_s25  ;;  %16 = sbr.rel (!%p14_p1) target bundleno = 5 (0x5), region = 76 }
 0x2a4   :  { %2295 = vsyncpa [#allocation3], 1 }
 0x2a5   :  { %2297 = vsyncpa [#allocation3 + $0x1], 1 }
 0x2a6   :  { %2298 = vsyncpa [#allocation5], 1 }

</bundles_post_ra>
